<compile_context>
chip_gen: v7x
topology: tpu7x:2x2x1
jax: 0.10.0
libtpu: 0.0.40
codegen_flags: <defaults>
</compile_context>

<pallas_src>
import functools

import jax
import jax.numpy as jnp
from jax.experimental import pallas as pl
from jax.experimental.pallas import tpu as pltpu

_NEG = -1e30          # large negative instead of -inf (avoids inf-inf NaNs on padding)
_NUM_CORE_SPLITS = 2  # leading "parallel" grid axis -> both TensorCores on v7x


def _round_up(x, m):
    return ((x + m - 1) // m) * m


def _default_bf16_act():
    # bf16 VPU/EUP exists on v6e/v7x; keep f32 activations on v5e / unknown devices.
    try:
        kind = jax.devices()[0].device_kind.lower()
    except Exception:
        return False
    return ("v6" in kind) or ("v7" in kind)


def _bclassifier_kernel(feats_ref, qmax_ref, w1_ref, b1_ref, w2_ref, b2_ref,
                        logits_ref, bacc_ref, m_ref, l_ref,
                        m_sc, l_sc, bacc_sc,
                        *, n_valid, n_pad, tile_n, inner_steps, bf16_act):
    step = pl.program_id(1)          # position within this core's slice of N

    @pl.when(step == 0)
    def _init():
        m_sc[...] = jnp.full_like(m_sc, _NEG)
        l_sc[...] = jnp.zeros_like(l_sc)
        bacc_sc[...] = jnp.zeros_like(bacc_sc)

    feats = feats_ref[...]                       # [tile_n, D] f32
    feats_bf = feats.astype(jnp.bfloat16)        # cast once, reused by both matmuls

    # q_net: Linear -> ReLU -> Linear -> Tanh. bf16 MXU inputs (weights arrive bf16),
    # f32 accumulation; bias/ReLU in f32, tanh in bf16 only where the EUP supports it.
    h = jnp.dot(feats_bf, w1_ref[...], preferred_element_type=jnp.float32) + b1_ref[...]
    h = jnp.maximum(h, 0.0)
    h = jnp.dot(h.astype(jnp.bfloat16), w2_ref[...],
                preferred_element_type=jnp.float32) + b2_ref[...]
    if bf16_act:
        q = jnp.tanh(h.astype(jnp.bfloat16))             # bf16 EUP (v6e/v7x)
    else:
        q = jnp.tanh(h).astype(jnp.bfloat16)             # f32 EUP (v5e-safe)

    # Lane-dense attention logits [C, tile_n] = q_max_scaled @ q^T
    # (1/sqrt(128) already folded into qmax in the wrapper).
    logits = jax.lax.dot_general(
        qmax_ref[...], q, (((1,), (1,)), ((), ())),
        preferred_element_type=jnp.float32)

    if n_pad != n_valid:  # mask padded rows only when padding exists (trace-time)
        base = (pl.program_id(0) * inner_steps + step) * tile_n
        col = jax.lax.broadcasted_iota(jnp.int32, logits.shape, 1) + base
        logits = jnp.where(col < n_valid, logits, _NEG)

    logits_ref[...] = logits                     # unnormalized A^T tile (lane-dense)

    # Online softmax over instances + B = A^T @ V accumulation (V = feats, Identity).
    m_prev = m_sc[...]                                                   # [C, 1]
    m_new = jnp.maximum(m_prev, jnp.max(logits, axis=1, keepdims=True))  # [C, 1]
    alpha = jnp.exp(m_prev - m_new)                                      # [C, 1]
    p = jnp.exp(logits - m_new)                                          # [C, tile_n]
    l_sc[...] = alpha * l_sc[...] + jnp.sum(p, axis=1, keepdims=True)
    bacc_sc[...] = alpha * bacc_sc[...] + jnp.dot(
        p.astype(jnp.bfloat16), feats_bf, preferred_element_type=jnp.float32)
    m_sc[...] = m_new

    @pl.when(step == inner_steps - 1)
    def _finalize():
        # Per-core partials; cross-core combine + fcc epilogue happen in the wrapper.
        bacc_ref[0] = bacc_sc[...]
        m_ref[0] = m_sc[...]
        l_ref[0] = l_sc[...]


def bclassifier_forward(feats, c, params, *, tile_n=None, bf16_act=None):
    """Forward pass of BClassifier(nonlinear=True, passing_v=False)."""
    w1, b1, w2, b2, fcc_w, fcc_b = params
    n, d = feats.shape
    n_cls = c.shape[1]
    if bf16_act is None:
        bf16_act = _default_bf16_act()

    # glue: torch.sort(c, 0, descending=True)[1][0, :] == per-class argmax over instances
    # TODO(synk): argmax tie-breaking may differ from torch.sort on exact score ties.
    m_idx = jnp.argmax(c, axis=0)                         # [C]
    m_feats = jnp.take(feats, m_idx, axis=0)              # [C, D]

    # q_max computed once in the wrapper (tiny), 1/sqrt(128) folded in, pre-cast bf16.
    q_max = jnp.tanh(jnp.maximum(m_feats @ w1 + b1, 0.0) @ w2 + b2)     # [C, 128] f32
    scale = float(q_max.shape[1]) ** -0.5
    q_max_b = (q_max * scale).astype(jnp.bfloat16)

    # D-aware tile: target ~2 MiB of feats per step, multiple of 128, cap 4096 so the
    # [tile_n, 128] q_net intermediates stay a few MiB; clamp for small N.
    if tile_n is None:
        tile_n = (2 * 1024 * 1024) // (4 * d)
        tile_n = max(1024, min(4096, tile_n))
    tile_n = max(128, _round_up(int(tile_n), 128))
    tile_n = min(tile_n, _round_up(pl.cdiv(n, _NUM_CORE_SPLITS), 128))

    total_tiles = pl.cdiv(n, tile_n)
    inner_steps = pl.cdiv(total_tiles, _NUM_CORE_SPLITS)   # N-tiles per core
    n_pad = _NUM_CORE_SPLITS * inner_steps * tile_n
    feats_p = feats if n_pad == n else jnp.pad(feats, ((0, n_pad - n), (0, 0)))

    # Pre-cast weights to bf16 (resident, no per-step cast); biases stay f32.
    w1_b = w1.astype(jnp.bfloat16)
    w2_b = w2.astype(jnp.bfloat16)
    b1_r = b1.reshape(1, -1).astype(jnp.float32)
    b2_r = b2.reshape(1, -1).astype(jnp.float32)

    kern = functools.partial(_bclassifier_kernel, n_valid=n, n_pad=n_pad,
                             tile_n=tile_n, inner_steps=inner_steps,
                             bf16_act=bf16_act)

    grid_spec = pltpu.PrefetchScalarGridSpec(
        num_scalar_prefetch=0,
        grid=(_NUM_CORE_SPLITS, inner_steps),               # (core split, N tiles)
        in_specs=[
            pl.BlockSpec((tile_n, d), lambda ci, ni: (ci * inner_steps + ni, 0)),  # feats
            pl.BlockSpec((n_cls, 128), lambda ci, ni: (0, 0)),   # q_max (resident, bf16)
            pl.BlockSpec((d, 128), lambda ci, ni: (0, 0)),       # W1 (bf16, resident)
            pl.BlockSpec((1, 128), lambda ci, ni: (0, 0)),       # b1
            pl.BlockSpec((128, 128), lambda ci, ni: (0, 0)),     # W2 (bf16, resident)
            pl.BlockSpec((1, 128), lambda ci, ni: (0, 0)),       # b2
        ],
        out_specs=(
            pl.BlockSpec((n_cls, tile_n),
                         lambda ci, ni: (0, ci * inner_steps + ni)),  # A^T logits
            pl.BlockSpec((1, n_cls, d), lambda ci, ni: (ci, 0, 0)),   # B accumulator (per core)
            pl.BlockSpec((1, n_cls, 1), lambda ci, ni: (ci, 0, 0)),   # softmax max (per core)
            pl.BlockSpec((1, n_cls, 1), lambda ci, ni: (ci, 0, 0)),   # softmax sum-exp (per core)
        ),
        scratch_shapes=[
            pltpu.VMEM((n_cls, 1), jnp.float32),    # running max
            pltpu.VMEM((n_cls, 1), jnp.float32),    # running sum-exp
            pltpu.VMEM((n_cls, d), jnp.float32),    # B accumulator
        ],
    )

    out_shapes = (
        jax.ShapeDtypeStruct((n_cls, n_pad), jnp.float32),
        jax.ShapeDtypeStruct((_NUM_CORE_SPLITS, n_cls, d), jnp.float32),
        jax.ShapeDtypeStruct((_NUM_CORE_SPLITS, n_cls, 1), jnp.float32),
        jax.ShapeDtypeStruct((_NUM_CORE_SPLITS, n_cls, 1), jnp.float32),
    )

    # Compute a VMEM budget from the actual footprint (double-buffered feats + logits,
    # q_net intermediates, resident weights, scratch) instead of a fixed 48 MiB cap.
    vmem_est = (2 * tile_n * d * 4 + 2 * n_cls * tile_n * 4 + tile_n * 128 * 12
                + tile_n * n_cls * 8 + d * 128 * 2 + 128 * 128 * 2 + 1024
                + n_cls * (d + 130) * 4 + 2 * n_cls * (d + 2) * 4)
    vmem_limit = int(min(48 * 1024 * 1024, max(16 * 1024 * 1024, 2 * vmem_est)))

    logits_t, bacc_parts, m_parts, l_parts = pl.pallas_call(
        kern,
        grid_spec=grid_spec,
        out_shape=out_shapes,
        compiler_params=pltpu.CompilerParams(
            dimension_semantics=("parallel", "arbitrary"),
            vmem_limit_bytes=vmem_limit,
        ),
    )(feats_p, q_max_b, w1_b, b1_r, w2_b, b2_r)

    # Combine the two per-core online-softmax partials (tiny, exact f32 divides).
    m0, m1 = m_parts[0], m_parts[1]                       # [C, 1] each
    m_g = jnp.maximum(m0, m1)
    e0 = jnp.exp(m0 - m_g)
    e1 = jnp.exp(m1 - m_g)
    l_g = l_parts[0] * e0 + l_parts[1] * e1               # [C, 1]
    b = (bacc_parts[0] * e0 + bacc_parts[1] * e1) / l_g   # [C, D]

    # Finish softmax for A from the global stats (cheap [C, N] pass + transpose to
    # match the torch [N, C] output layout).
    a = (jnp.exp(logits_t[:, :n] - m_g) / l_g).T          # [N, C]

    # fcc: Conv1d(C, C, kernel_size=D) on B[1,C,D] == full contraction with fcc_w.
    c_out = (jnp.einsum('oid,id->o', fcc_w, b) + fcc_b).reshape(1, n_cls)
    return c_out, a, b.reshape(1, n_cls, d)


def bclassifier_ref(feats, c, params):
    # pure-JAX f32 reference for correctness checking
    w1, b1, w2, b2, fcc_w, fcc_b = params

    def q_net(x):
        h = jnp.maximum(x @ w1 + b1, 0.0)
        return jnp.tanh(h @ w2 + b2)

    q = q_net(feats)
    m_idx = jnp.argmax(c, axis=0)
    q_max = q_net(feats[m_idx])
    a = jax.nn.softmax(q @ q_max.T / jnp.sqrt(jnp.float32(q.shape[1])), axis=0)
    b = a.T @ feats
    n_cls, d = b.shape
    c_out = b.reshape(-1) @ fcc_w.reshape(n_cls, n_cls * d).T + fcc_b
    return c_out.reshape(1, -1), a, b.reshape(1, n_cls, d)


def _make_inputs(key, n, d, n_cls):
    ks = jax.random.split(key, 8)
    feats = jax.random.normal(ks[0], (n, d), jnp.float32)
    c = jax.random.normal(ks[1], (n, n_cls), jnp.float32)
    w1 = jax.random.normal(ks[2], (d, 128), jnp.float32) * 0.1
    b1 = jax.random.normal(ks[3], (128,), jnp.float32) * 0.1
    w2 = jax.random.normal(ks[4], (128, 128), jnp.float32) * 0.1
    b2 = jax.random.normal(ks[5], (128,), jnp.float32) * 0.1
    fcc_w = jax.random.normal(ks[6], (n_cls, n_cls, d), jnp.float32) * 0.1
    fcc_b = jax.random.normal(ks[7], (n_cls,), jnp.float32) * 0.1
    return feats, c, (w1, b1, w2, b2, fcc_w, fcc_b)


def _check(feats, c, params, atol=5e-2, rtol=5e-2, **kw):
    c_out, a, b = jax.block_until_ready(bclassifier_forward(feats, c, params, **kw))
    c_r, a_r, b_r = bclassifier_ref(feats, c, params)
    # bf16 MXU inputs (f32 accumulation) -> tolerances relaxed vs pure-f32 math.
    assert jnp.allclose(a, a_r, atol=atol, rtol=rtol), "A mismatch"
    assert jnp.allclose(b, b_r, atol=atol, rtol=rtol), "B mismatch"
    assert jnp.allclose(c_out, c_r, atol=atol, rtol=rtol), "C mismatch"


if __name__ == "__main__":
    key = jax.random.PRNGKey(0)
    k1, k2 = jax.random.split(key)

    # small shapes consistent with the module: N instances x input_size, output_class
    feats, c, params = _make_inputs(k1, n=8, d=32, n_cls=4)
    _check(feats, c, params)

    # multi-tile path: N spanning several tiles per core with a ragged last tile
    # (exercises the online softmax across grid steps, the dual-core partial combine,
    # and padded-row masking).
    feats2, c2, params2 = _make_inputs(k2, n=1030, d=32, n_cls=4)
    _check(feats2, c2, params2, tile_n=256)

    print("KERNEL_OK")
</pallas_src>

<mosaic_0001>
module attributes {stable_mosaic.version = 11 : i64} {
  func.func @_bclassifier_kernel(%arg0: i32, %arg1: i32, %arg2: memref<128x32xf32, #tpu.memory_space<vmem>>, %arg3: memref<4x128xbf16, #tpu.memory_space<vmem>>, %arg4: memref<32x128xbf16, #tpu.memory_space<vmem>>, %arg5: memref<1x128xf32, #tpu.memory_space<vmem>>, %arg6: memref<128x128xbf16, #tpu.memory_space<vmem>>, %arg7: memref<1x128xf32, #tpu.memory_space<vmem>>, %arg8: memref<4x128xf32, #tpu.memory_space<vmem>>, %arg9: memref<1x4x32xf32, #tpu.memory_space<vmem>>, %arg10: memref<1x4x1xf32, #tpu.memory_space<vmem>>, %arg11: memref<1x4x1xf32, #tpu.memory_space<vmem>>, %arg12: memref<4x1xf32, #tpu.memory_space<vmem>>, %arg13: memref<4x1xf32, #tpu.memory_space<vmem>>, %arg14: memref<4x32xf32, #tpu.memory_space<vmem>>) attributes {dimension_semantics = [#tpu.dimension_semantics<parallel>, #tpu.dimension_semantics<arbitrary>], iteration_bounds = array<i64: 2, 1>, scalar_prefetch = 0 : i64, scratch_operands = 3 : i64, tpu.core_type = #tpu.core_type<tc>, window_params = [{transform_indices = @transform_0, window_bounds = array<i64: 128, 32>}, {pipeline_mode = #tpu.pipeline_mode<synchronous>, transform_indices = @transform_1, window_bounds = array<i64: 4, 128>}, {pipeline_mode = #tpu.pipeline_mode<synchronous>, transform_indices = @transform_2, window_bounds = array<i64: 32, 128>}, {pipeline_mode = #tpu.pipeline_mode<synchronous>, transform_indices = @transform_3, window_bounds = array<i64: 1, 128>}, {pipeline_mode = #tpu.pipeline_mode<synchronous>, transform_indices = @transform_4, window_bounds = array<i64: 128, 128>}, {pipeline_mode = #tpu.pipeline_mode<synchronous>, transform_indices = @transform_5, window_bounds = array<i64: 1, 128>}, {transform_indices = @transform_6, window_bounds = array<i64: 4, 128>}, {transform_indices = @transform_7, window_bounds = array<i64: 1, 4, 32>}, {transform_indices = @transform_8, window_bounds = array<i64: 1, 4, 1>}, {transform_indices = @transform_9, window_bounds = array<i64: 1, 4, 1>}]} {
    %c0_i32 = arith.constant 0 : i32
    %0 = arith.cmpi eq, %arg1, %c0_i32 : i32
    %1 = arith.extui %0 : i1 to i32
    %c0_i32_0 = arith.constant 0 : i32
    %2 = arith.cmpi ne, %1, %c0_i32_0 : i32
    scf.if %2 {
      %cst_35 = arith.constant -1.000000e+30 : f32
      %59 = vector.broadcast %cst_35 : f32 to vector<4x1xf32>
      %c0_36 = arith.constant 0 : index
      %c0_37 = arith.constant 0 : index
      %60 = vector.load %arg12[%c0_36, %c0_37] : memref<4x1xf32, #tpu.memory_space<vmem>>, vector<4x1xf32>
      tpu.vector_store %arg12[%c0_36, %c0_37], %59 {strides = array<i32>} : memref<4x1xf32, #tpu.memory_space<vmem>>, vector<4x1xf32>,
      %cst_38 = arith.constant 0.000000e+00 : f32
      %61 = vector.broadcast %cst_38 : f32 to vector<4x1xf32>
      %c0_39 = arith.constant 0 : index
      %c0_40 = arith.constant 0 : index
      %62 = vector.load %arg13[%c0_39, %c0_40] : memref<4x1xf32, #tpu.memory_space<vmem>>, vector<4x1xf32>
      tpu.vector_store %arg13[%c0_39, %c0_40], %61 {strides = array<i32>} : memref<4x1xf32, #tpu.memory_space<vmem>>, vector<4x1xf32>,
      %cst_41 = arith.constant 0.000000e+00 : f32
      %63 = vector.broadcast %cst_41 : f32 to vector<4x32xf32>
      %c0_42 = arith.constant 0 : index
      %c0_43 = arith.constant 0 : index
      %64 = vector.load %arg14[%c0_42, %c0_43] : memref<4x32xf32, #tpu.memory_space<vmem>>, vector<4x32xf32>
      tpu.vector_store %arg14[%c0_42, %c0_43], %63 {strides = array<i32>} : memref<4x32xf32, #tpu.memory_space<vmem>>, vector<4x32xf32>,
    } else {
    }
    %c0 = arith.constant 0 : index
    %c0_1 = arith.constant 0 : index
    %3 = vector.load %arg2[%c0, %c0_1] : memref<128x32xf32, #tpu.memory_space<vmem>>, vector<128x32xf32>
    %4 = arith.truncf %3 : vector<128x32xf32> to vector<128x32xbf16>
    %c0_2 = arith.constant 0 : index
    %c0_3 = arith.constant 0 : index
    %5 = vector.load %arg4[%c0_2, %c0_3] : memref<32x128xbf16, #tpu.memory_space<vmem>>, vector<32x128xbf16>
    %cst = arith.constant dense<0.000000e+00> : vector<128x128xf32>
    %6 = tpu.matmul %4, %5, %cst {dimension_numbers = #tpu.dot_dimension_numbers<[1], [0], [0], [1], [0, 0, 1, 1], [], []>} : vector<128x32xbf16>, vector<32x128xbf16>, vector<128x128xf32> -> vector<128x128xf32>
    %c0_4 = arith.constant 0 : index
    %c0_5 = arith.constant 0 : index
    %7 = vector.load %arg5[%c0_4, %c0_5] : memref<1x128xf32, #tpu.memory_space<vmem>>, vector<1x128xf32>
    %8 = vector.broadcast %7 : vector<1x128xf32> to vector<128x128xf32>
    %9 = arith.addf %6, %8 : vector<128x128xf32>
    %cst_6 = arith.constant 0.000000e+00 : f32
    %10 = vector.broadcast %cst_6 : f32 to vector<128x128xf32>
    %11 = arith.maximumf %9, %10 : vector<128x128xf32>
    %12 = arith.truncf %11 : vector<128x128xf32> to vector<128x128xbf16>
    %c0_7 = arith.constant 0 : index
    %c0_8 = arith.constant 0 : index
    %13 = vector.load %arg6[%c0_7, %c0_8] : memref<128x128xbf16, #tpu.memory_space<vmem>>, vector<128x128xbf16>
    %cst_9 = arith.constant dense<0.000000e+00> : vector<128x128xf32>
    %14 = tpu.matmul %12, %13, %cst_9 {dimension_numbers = #tpu.dot_dimension_numbers<[1], [0], [0], [1], [0, 0, 1, 1], [], []>} : vector<128x128xbf16>, vector<128x128xbf16>, vector<128x128xf32> -> vector<128x128xf32>
    %c0_10 = arith.constant 0 : index
    %c0_11 = arith.constant 0 : index
    %15 = vector.load %arg7[%c0_10, %c0_11] : memref<1x128xf32, #tpu.memory_space<vmem>>, vector<1x128xf32>
    %16 = vector.broadcast %15 : vector<1x128xf32> to vector<128x128xf32>
    %17 = arith.addf %14, %16 : vector<128x128xf32>
    %18 = math.tanh %17 : vector<128x128xf32>
    %19 = arith.truncf %18 : vector<128x128xf32> to vector<128x128xbf16>
    %c0_12 = arith.constant 0 : index
    %c0_13 = arith.constant 0 : index
    %20 = vector.load %arg3[%c0_12, %c0_13] : memref<4x128xbf16, #tpu.memory_space<vmem>>, vector<4x128xbf16>
    %cst_14 = arith.constant dense<0.000000e+00> : vector<4x128xf32>
    %21 = tpu.matmul %20, %19, %cst_14 {dimension_numbers = #tpu.dot_dimension_numbers<[1], [1], [0], [0], [0, 0, 1, 0], [], []>} : vector<4x128xbf16>, vector<128x128xbf16>, vector<4x128xf32> -> vector<4x128xf32>
    %c1_i32 = arith.constant 1 : i32
    %22 = arith.muli %arg0, %c1_i32 : i32
    %23 = arith.addi %22, %arg1 : i32
    %c128_i32 = arith.constant 128 : i32
    %24 = arith.muli %23, %c128_i32 : i32
    %25 = tpu.iota {dimensions = array<i32: 1>} : vector<4x128xi32>
    %26 = vector.broadcast %24 : i32 to vector<4x128xi32>
    %27 = arith.addi %25, %26 : vector<4x128xi32>
    %c8_i32 = arith.constant 8 : i32
    %28 = vector.broadcast %c8_i32 : i32 to vector<4x128xi32>
    %29 = arith.cmpi slt, %27, %28 : vector<4x128xi32>
    %cst_15 = arith.constant -1.000000e+30 : f32
    %30 = vector.broadcast %cst_15 : f32 to vector<4x128xf32>
    %31 = arith.select %29, %21, %30 : vector<4x128xi1>, vector<4x128xf32>
    %c0_16 = arith.constant 0 : index
    %c0_17 = arith.constant 0 : index
    %32 = vector.load %arg8[%c0_16, %c0_17] : memref<4x128xf32, #tpu.memory_space<vmem>>, vector<4x128xf32>
    tpu.vector_store %arg8[%c0_16, %c0_17], %31 {strides = array<i32>} : memref<4x128xf32, #tpu.memory_space<vmem>>, vector<4x128xf32>,
    %c0_18 = arith.constant 0 : index
    %c0_19 = arith.constant 0 : index
    %33 = vector.load %arg12[%c0_18, %c0_19] : memref<4x1xf32, #tpu.memory_space<vmem>>, vector<4x1xf32>
    %cst_20 = arith.constant dense<0xFF800000> : vector<4xf32>
    %34 = vector.multi_reduction <maximumf>, %31, %cst_20 [1] : vector<4x128xf32> to vector<4xf32>
    %35 = vector.shape_cast %34 : vector<4xf32> to vector<4x1xf32>
    %36 = arith.maximumf %33, %35 : vector<4x1xf32>
    %37 = arith.subf %33, %36 : vector<4x1xf32>
    %38 = math.exp %37 : vector<4x1xf32>
    %39 = vector.broadcast %36 : vector<4x1xf32> to vector<4x128xf32>
    %40 = arith.subf %31, %39 : vector<4x128xf32>
    %41 = math.exp %40 : vector<4x128xf32>
    %c0_21 = arith.constant 0 : index
    %c0_22 = arith.constant 0 : index
    %42 = vector.load %arg13[%c0_21, %c0_22] : memref<4x1xf32, #tpu.memory_space<vmem>>, vector<4x1xf32>
    %43 = arith.mulf %38, %42 : vector<4x1xf32>
    %cst_23 = arith.constant dense<0.000000e+00> : vector<4xf32>
    %44 = vector.multi_reduction <add>, %41, %cst_23 [1] : vector<4x128xf32> to vector<4xf32>
    %45 = vector.shape_cast %44 : vector<4xf32> to vector<4x1xf32>
    %46 = arith.addf %43, %45 : vector<4x1xf32>
    %c0_24 = arith.constant 0 : index
    %c0_25 = arith.constant 0 : index
    %47 = vector.load %arg13[%c0_24, %c0_25] : memref<4x1xf32, #tpu.memory_space<vmem>>, vector<4x1xf32>
    tpu.vector_store %arg13[%c0_24, %c0_25], %46 {strides = array<i32>} : memref<4x1xf32, #tpu.memory_space<vmem>>, vector<4x1xf32>,
    %c0_26 = arith.constant 0 : index
    %c0_27 = arith.constant 0 : index
    %48 = vector.load %arg14[%c0_26, %c0_27] : memref<4x32xf32, #tpu.memory_space<vmem>>, vector<4x32xf32>
    %49 = vector.broadcast %38 : vector<4x1xf32> to vector<4x32xf32>
    %50 = arith.mulf %49, %48 : vector<4x32xf32>
    %51 = arith.truncf %41 : vector<4x128xf32> to vector<4x128xbf16>
    %cst_28 = arith.constant dense<0.000000e+00> : vector<4x32xf32>
    %52 = tpu.matmul %51, %4, %cst_28 {dimension_numbers = #tpu.dot_dimension_numbers<[1], [0], [0], [1], [0, 0, 1, 1], [], []>} : vector<4x128xbf16>, vector<128x32xbf16>, vector<4x32xf32> -> vector<4x32xf32>
    %53 = arith.addf %50, %52 : vector<4x32xf32>
    %c0_29 = arith.constant 0 : index
    %c0_30 = arith.constant 0 : index
    %54 = vector.load %arg14[%c0_29, %c0_30] : memref<4x32xf32, #tpu.memory_space<vmem>>, vector<4x32xf32>
    tpu.vector_store %arg14[%c0_29, %c0_30], %53 {strides = array<i32>} : memref<4x32xf32, #tpu.memory_space<vmem>>, vector<4x32xf32>,
    %c0_31 = arith.constant 0 : index
    %c0_32 = arith.constant 0 : index
    %55 = vector.load %arg12[%c0_31, %c0_32] : memref<4x1xf32, #tpu.memory_space<vmem>>, vector<4x1xf32>
    tpu.vector_store %arg12[%c0_31, %c0_32], %36 {strides = array<i32>} : memref<4x1xf32, #tpu.memory_space<vmem>>, vector<4x1xf32>,
    %c0_i32_33 = arith.constant 0 : i32
    %56 = arith.cmpi eq, %arg1, %c0_i32_33 : i32
    %57 = arith.extui %56 : i1 to i32
    %c0_i32_34 = arith.constant 0 : i32
    %58 = arith.cmpi ne, %57, %c0_i32_34 : i32
    scf.if %58 {
      %c0_35 = arith.constant 0 : index
      %c0_36 = arith.constant 0 : index
      %59 = vector.load %arg14[%c0_35, %c0_36] : memref<4x32xf32, #tpu.memory_space<vmem>>, vector<4x32xf32>
      %c0_37 = arith.constant 0 : index
      %c0_38 = arith.constant 0 : index
      %c0_39 = arith.constant 0 : index
      %60 = vector.load %arg9[%c0_37, %c0_38, %c0_39] : memref<1x4x32xf32, #tpu.memory_space<vmem>>, vector<1x4x32xf32>
      %61 = vector.shape_cast %60 : vector<1x4x32xf32> to vector<4x32xf32>
      %62 = vector.shape_cast %59 : vector<4x32xf32> to vector<1x4x32xf32>
      tpu.vector_store %arg9[%c0_37, %c0_38, %c0_39], %62 {strides = array<i32>} : memref<1x4x32xf32, #tpu.memory_space<vmem>>, vector<1x4x32xf32>,
      %c0_40 = arith.constant 0 : index
      %c0_41 = arith.constant 0 : index
      %63 = vector.load %arg12[%c0_40, %c0_41] : memref<4x1xf32, #tpu.memory_space<vmem>>, vector<4x1xf32>
      %c0_42 = arith.constant 0 : index
      %c0_43 = arith.constant 0 : index
      %c0_44 = arith.constant 0 : index
      %64 = vector.load %arg10[%c0_42, %c0_43, %c0_44] : memref<1x4x1xf32, #tpu.memory_space<vmem>>, vector<1x4x1xf32>
      %65 = vector.shape_cast %64 : vector<1x4x1xf32> to vector<4x1xf32>
      %66 = vector.shape_cast %63 : vector<4x1xf32> to vector<1x4x1xf32>
      tpu.vector_store %arg10[%c0_42, %c0_43, %c0_44], %66 {strides = array<i32>} : memref<1x4x1xf32, #tpu.memory_space<vmem>>, vector<1x4x1xf32>,
      %c0_45 = arith.constant 0 : index
      %c0_46 = arith.constant 0 : index
      %67 = vector.load %arg13[%c0_45, %c0_46] : memref<4x1xf32, #tpu.memory_space<vmem>>, vector<4x1xf32>
      %c0_47 = arith.constant 0 : index
      %c0_48 = arith.constant 0 : index
      %c0_49 = arith.constant 0 : index
      %68 = vector.load %arg11[%c0_47, %c0_48, %c0_49] : memref<1x4x1xf32, #tpu.memory_space<vmem>>, vector<1x4x1xf32>
      %69 = vector.shape_cast %68 : vector<1x4x1xf32> to vector<4x1xf32>
      %70 = vector.shape_cast %67 : vector<4x1xf32> to vector<1x4x1xf32>
      tpu.vector_store %arg11[%c0_47, %c0_48, %c0_49], %70 {strides = array<i32>} : memref<1x4x1xf32, #tpu.memory_space<vmem>>, vector<1x4x1xf32>,
    } else {
    }
    return
  }
  func.func @transform_0(%arg0: i32, %arg1: i32) -> (i32, i32) {
    %c1_i32 = arith.constant 1 : i32
    %0 = arith.muli %arg0, %c1_i32 : i32
    %1 = arith.addi %0, %arg1 : i32
    %c0_i32 = arith.constant 0 : i32
    %c0_i32_0 = arith.constant 0 : i32
    return %1, %c0_i32 : i32, i32
  }
  func.func @transform_1(%arg0: i32, %arg1: i32) -> (i32, i32) {
    %c0_i32 = arith.constant 0 : i32
    %c0_i32_0 = arith.constant 0 : i32
    %c0_i32_1 = arith.constant 0 : i32
    return %c0_i32, %c0_i32_0 : i32, i32
  }
  func.func @transform_2(%arg0: i32, %arg1: i32) -> (i32, i32) {
    %c0_i32 = arith.constant 0 : i32
    %c0_i32_0 = arith.constant 0 : i32
    %c0_i32_1 = arith.constant 0 : i32
    return %c0_i32, %c0_i32_0 : i32, i32
  }
  func.func @transform_3(%arg0: i32, %arg1: i32) -> (i32, i32) {
    %c0_i32 = arith.constant 0 : i32
    %c0_i32_0 = arith.constant 0 : i32
    %c0_i32_1 = arith.constant 0 : i32
    return %c0_i32, %c0_i32_0 : i32, i32
  }
  func.func @transform_4(%arg0: i32, %arg1: i32) -> (i32, i32) {
    %c0_i32 = arith.constant 0 : i32
    %c0_i32_0 = arith.constant 0 : i32
    %c0_i32_1 = arith.constant 0 : i32
    return %c0_i32, %c0_i32_0 : i32, i32
  }
  func.func @transform_5(%arg0: i32, %arg1: i32) -> (i32, i32) {
    %c0_i32 = arith.constant 0 : i32
    %c0_i32_0 = arith.constant 0 : i32
    %c0_i32_1 = arith.constant 0 : i32
    return %c0_i32, %c0_i32_0 : i32, i32
  }
  func.func @transform_6(%arg0: i32, %arg1: i32) -> (i32, i32) {
    %c1_i32 = arith.constant 1 : i32
    %0 = arith.muli %arg0, %c1_i32 : i32
    %1 = arith.addi %0, %arg1 : i32
    %c0_i32 = arith.constant 0 : i32
    %c0_i32_0 = arith.constant 0 : i32
    return %c0_i32, %1 : i32, i32
  }
  func.func @transform_7(%arg0: i32, %arg1: i32) -> (i32, i32, i32) {
    %c0_i32 = arith.constant 0 : i32
    %c0_i32_0 = arith.constant 0 : i32
    %c0_i32_1 = arith.constant 0 : i32
    return %arg0, %c0_i32, %c0_i32_0 : i32, i32, i32
  }
  func.func @transform_8(%arg0: i32, %arg1: i32) -> (i32, i32, i32) {
    %c0_i32 = arith.constant 0 : i32
    %c0_i32_0 = arith.constant 0 : i32
    %c0_i32_1 = arith.constant 0 : i32
    return %arg0, %c0_i32, %c0_i32_0 : i32, i32, i32
  }
  func.func @transform_9(%arg0: i32, %arg1: i32) -> (i32, i32, i32) {
    %c0_i32 = arith.constant 0 : i32
    %c0_i32_0 = arith.constant 0 : i32
    %c0_i32_1 = arith.constant 0 : i32
    return %arg0, %c0_i32, %c0_i32_0 : i32, i32, i32
  }
}

</mosaic_0001>

<bundles_post_ra>
// kernel: tpu_custom_call.1
= control target key start
LH: loop header
LB: loop body
LE: loop exit
PB: predicated region body
PF: predicated region fallthrough
CT: control target
= control target key end

     0   :  { %s1860_s0 = inlined_call_operand.vmem [shape: f32[256,32], index: 0, kind: input, shape index: {}]   ;;  %s1861_s1 = inlined_call_operand.vmem [shape: bf16[4,128], index: 1, kind: input, shape index: {}]   ;;  %s1862_s2 = inlined_call_operand.vmem [shape: bf16[32,128], index: 2, kind: input, shape index: {}]   ;;  %s1863_s3 = inlined_call_operand.vmem [shape: f32[1,128], index: 3, kind: input, shape index: {}]   ;;  %s1864_s4 = inlined_call_operand.vmem [shape: bf16[128,128], index: 4, kind: input, shape index: {}]   ;;  %s1865_s5 = inlined_call_operand.vmem [shape: f32[1,128], index: 5, kind: input, shape index: {}]   ;;  %s1866_s6 = inlined_call_operand.hbm [shape: f32[4,256], index: 6, kind: output, shape index: {0}]   ;;  %s1867_s7 = inlined_call_operand.hbm [shape: f32[2,4,32], index: 7, kind: output, shape index: {1}]   ;;  %s1868_s8 = inlined_call_operand.vmem [shape: f32[2,4,1], index: 8, kind: output, shape index: {2}]   ;;  %s1869_s9 = inlined_call_operand.vmem [shape: f32[2,4,1], index: 9, kind: output, shape index: {3}]  }
   0x1   :  { %1873 = sst [smem:[#allocation11_spill]] %s1860_s0 }
   0x2   :  { %1874 = sst [smem:[#allocation12_spill]] %s1861_s1 }
   0x3   :  { %15 = vsyncpa [#allocation6], 0 }
   0x4   :  { %17 = vsyncpa [#allocation6 + $0x1], 0 }
   0x5   :  { %18 = vsyncpa [#allocation8], 0 }
   0x6   :  { %20 = vsyncpa [#allocation8 + $0x1], 0  ;;  %s1566_s30 = smov 0   ;;  %s1568_s10 = smov 0  }
   0x7   :  { %s1570_s11 = smov 0   ;;  %s1572_s12 = smov 0  }
   0x8   :  { %s1574_s13 = smov 0   ;;  %s1576_s14 = smov 0  }
   0x9 LB: > { %s1112_s15 = sadd.s32 4294967295, %s1508_s14   ;;  %s1113_s16 = sadd.s32 4294967294, %s1508_s14   ;;  %s1508_s14 = sphi %s1576_s14, %s26_s14   ;;  %s1504_s13 = sphi %s1574_s13, %s1886_s13   ;;  %s1500_s12 = sphi %s1572_s12, %s1885_s12   ;;  %s1496_s11 = sphi %s1570_s11, %s1884_s11   ;;  %s1492_s10 = sphi %s1568_s10, %s1883_s10   ;;  %s1488_s30 = sphi %s1566_s30, %s1882_s30  }
   0xa   : > { %s38_s17 = sadd.s32 1, %s1504_s13  ;;  %s180_s18 = sadd.s32 1, %s1496_s11 }
   0xb   : > { %p40_p0 = scmp.ge.s32.totalorder %s38_s17, 2  ;;  %p190_p1 = scmp.ne.s32.totalorder %s1496_s11, %s1492_s10 }
   0xc   : > { %p191_p2 = scmp.eq.s32.totalorder %s1112_s15, 1  ;;  %p196_p3 = scmp.ne.s32.totalorder %s1492_s10, %s1488_s30 }
   0xd   : > { %s1888_s17 = smov (%p40_p0, %s38_s17), 0  ;;  %p197_p5 = scmp.eq.s32.totalorder %s1113_s16, 1 }
   0xe   : > { %p1606_p4 = por %p191_p2, %p190_p1  ;;  %s177_s20 = ssub.s32 %s1504_s13, %s1888_s17 }
   0xf   : > { %p1116_p6 = scmp.ge.s32.totalorder %s1508_s14, 1  ;;  %p178_p7 = scmp.eq.s32.totalorder %s177_s20, 0 }
  0x10   : > { %p1613_p8 = por %p197_p5, %p196_p3  ;;  %p319_p9 = scmp.lt.s32.totalorder %s1508_s14, 3 }
  0x11   : > { %s1619_s22 = scalar_select %p178_p7, %s1496_s11, %s180_s18  }
  0x12   : > { %p320_p10 = pnand %p1116_p6, %p319_p9 }
  0x13   : > { %v1352_v0 = vld [vmem:[%s1862_s2] sm:$0xff] (!%p320_p10)   ;;  %s1119_s25 = sshll.u32 (!%p320_p10), %s1500_s12, 4  ;;  %v1353_v1 = vld [vmem:[%s1862_s2 + $0x8] sm:$0xff] (!%p320_p10)   ;;  %s1877_s0 = sld [smem:[#allocation11_spill]] (!%p320_p10)  ;;  %v1356_v4 = vld [vmem:[%s1864_s4 + $0x10] sm:$0xff] (!%p320_p10)   ;;  %vm443_vm0 = vcmask (!%p320_p10), 261120  }
  0x14   : > { %323 = sbr.rel (%p320_p10) target bundleno = 1288 (0x508), region = 44  ;;  %p371_p11 = scmp.lt.s32.totalorder (!%p320_p10), %s1119_s25, 31  ;;  %1194 = vmatprep.subr.bf16.mxu0 (!%p320_p10), %v1352_v0  ;;  %v1354_v2 = vld [vmem:[%s1864_s4] sm:$0xff] (!%p320_p10)   ;;  %v1355_v3 = vld [vmem:[%s1864_s4 + $0x8] sm:$0xff] (!%p320_p10)   ;;  %v1357_v14 = vld [vmem:[%s1864_s4 + $0x18] sm:$0xff] (!%p320_p10)   ;;  %vm1511_vm1 = vmmov (!%p320_p10), 0  }
  0x15   : > { %1195 = vmatpush3.bf16.msra.mxu0 (!%p320_p10), %v1352_v0  ;;  %1214 = vmatprep.subr.bf16.mxu1 (!%p320_p10), %v1354_v2  ;;  %v1358_v19 = vld [vmem:[%s1864_s4 + $0x20] sm:$0xff] (!%p320_p10)   ;;  %v1359_v22 = vld [vmem:[%s1864_s4 + $0x28] sm:$0xff] (!%p320_p10)   ;;  %v1360_v32 = vld [vmem:[%s1864_s4 + $0x30] sm:$0xff] (!%p320_p10)   ;;  %s1878_s1 = sld [smem:[#allocation12_spill]] (!%p320_p10)  ;;  %vm391_vm2 = vcmask (!%p320_p10), 3072   ;;  %s1745_s20 = sand.u32 (!%p320_p10), 1, %s1492_s10  }
  0x16   : > { %1196 = vmatprep.subr.bf16.mxu0 (!%p320_p10), %v1353_v1  ;;  %1215 = vmatpush3.bf16.msra.mxu1 (!%p320_p10), %v1354_v2  ;;  %v1361_v33 = vld [vmem:[%s1864_s4 + $0x38] sm:$0xff] (!%p320_p10)   ;;  %v1123_v34 = vld [vmem:[%s1863_s3] ss:$0 sm:$0xff] (!%p320_p10)  ;;  %s1870_s23 = sshll.u32 (!%p320_p10), %s1745_s20, 2  ;;  %vm832_vm4 = vcmask (!%p320_p10), 1043456   ;;  %p378_p12 = scmp.lt.s32.totalorder (!%p320_p10), %s1500_s12, 1 }
  0x17   : > { %1216 = vmatprep.subr.bf16.mxu1 (!%p320_p10), %v1355_v3  ;;  %s1750_s26 = scalar_lea.vmem (!%p320_p10), [#allocation5], %s1870_s23  ;;  %vm394_vm5 = vcmask (!%p320_p10), 257024   ;;  %s1872_s15 = sshll.u32 (!%p320_p10), %s1500_s12, 6 }
  0x18   : > { %s1775_s28 = scalar_lea.hbm (!%p320_p10), %s1866_s6, %s1872_s15 }
  0x19   : > { %1197 = vmatpush3.bf16.msra.mxu0 (!%p320_p10), %v1353_v1 }
  0x1a   : > { %1217 = vmatpush3.bf16.msra.mxu1 (!%p320_p10), %v1355_v3 }
  0x1b   : > { %s1890_s25 = smov (!%p371_p11, %s1119_s25), 31  ;;  %1218 = vmatprep.subr.bf16.mxu1 %v1356_v4 }
  0x1c   : > { %s1120_s18 = sshll.u32 %s1890_s25, 3 }
  0x1d   : > { %s1637_s24 = scalar_lea.vmem %s1877_s0, %s1120_s18  ;;  %s1143_s18 = sshll.u32 %s1500_s12, 7 }
  0x1e   : > { %v396_v5 = vld [vmem:[%s1637_s24] sm:$0xff]  ;;  %v397_v6 = vld [vmem:[%s1637_s24 + $0x8] sm:$0xff]  ;;  %v398_v7 = vld [vmem:[%s1637_s24 + $0x10] sm:$0xff]  ;;  %1219 = vmatpush3.bf16.msra.mxu1 %v1356_v4  ;;  %s1756_s27 = scalar_select %p378_p12, %s1500_s12, 1 }
  0x1f   : > { %v1645_v8 = vpack.c.bf16 %v397_v6, %v396_v5  ;;  %v399_v9 = vld [vmem:[%s1637_s24 + $0x18] sm:$0xff]  ;;  %v400_v10 = vld [vmem:[%s1637_s24 + $0x20] sm:$0xff]  ;;  %v401_v11 = vld [vmem:[%s1637_s24 + $0x28] sm:$0xff]  ;;  %1220 = vmatprep.subr.bf16.mxu1 %v1357_v14 }
  0x20   : > { %v1650_v12 = vpack.c.bf16 %v399_v9, %v398_v7  ;;  %v1652_v13 = vpack.c.bf16 %v401_v11, %v400_v10  ;;  %v402_v15 = vld [vmem:[%s1637_s24 + $0x30] sm:$0xff]  ;;  %v403_v16 = vld [vmem:[%s1637_s24 + $0x38] sm:$0xff]  ;;  %v404_v17 = vld [vmem:[%s1637_s24 + $0x40] sm:$0xff]  ;;  %s1871_s25 = sshll.u32 %s1756_s27, 2 }
  0x21   : > { %1198 = vmatprep.mubr.msk.bf16.mxu0 %vm443_vm0, %v1645_v8  ;;  %v405_v18 = vld [vmem:[%s1637_s24 + $0x48] sm:$0xff]  ;;  %v1670_v20 = vpack.c.bf16 %v403_v16, %v402_v15  ;;  %v406_v23 = vld [vmem:[%s1637_s24 + $0x50] sm:$0xff]  ;;  %v407_v24 = vld [vmem:[%s1637_s24 + $0x58] sm:$0xff]  ;;  %s381_s29 = scalar_lea.vmem %s1868_s8, %s1871_s25  ;;  %s1514_s25 = smov [#allocation5]  }
  0x22   : > { %1199 = vmatmul.mubr.msk.bf16.vlgmr.msra.gmra.mrb[0].mxu0 %vm443_vm0, %v1650_v12  ;;  %v1672_v21 = vpack.c.bf16 %v405_v18, %v404_v17  ;;  %1221 = vmatpush3.bf16.msra.mxu1 %v1357_v14  ;;  %v408_v25 = vld [vmem:[%s1637_s24 + $0x60] sm:$0xff]  ;;  %v409_v26 = vld [vmem:[%s1637_s24 + $0x68] sm:$0xff]  ;;  %v1685_v27 = vpack.c.bf16 %v407_v24, %v406_v23  ;;  %v410_v29 = vld [vmem:[%s1637_s24 + $0x70] sm:$0xff]  ;;  %s1402_s0 = sshll.u32 %s1514_s25, 4  ;;  %s1403_s0 = int_to_ptr.vmem [resolvable:$false] %s1402_s0 }
  0x23   : > { %1202 = vmatprep.mubr.msk.bf16.mxu0 %vm443_vm0, %v1652_v13  ;;  %1222 = vmatprep.subr.bf16.mxu1 %v1358_v19  ;;  %v1687_v28 = vpack.c.bf16 %v409_v26, %v408_v25  ;;  %v411_v30 = vld [vmem:[%s1637_s24 + $0x78] sm:$0xff]  ;;  %s945_s24 = sshll.u32 %s1750_s26, 4  ;;  %s946_s24 = int_to_ptr.vmem [resolvable:$true] %s945_s24 }
  0x24   : > { %v1695_v31 = vpack.c.bf16 %v411_v30, %v410_v29  ;;  %s1398_s23 = scalar_lea.vmem %s946_s24, 64  ;;  %p1405_p2 = scmp.lt.s32.totalorder %s946_s24, %s1403_s0 }
  0x25   : > { %p1399_p13 = scmp.ne.s32.totalorder %s946_s24, %s1398_s23 }
  0x26   : > { %1223 = vmatpush3.bf16.msra.mxu1 %v1358_v19 }
  0x27   : > { %1224 = vmatprep.subr.bf16.mxu1 %v1359_v22  ;;  %p1400_p0 = pnand %p1399_p13, %p1606_p4 }
  0x29   : > { %p1401_p1 = pneg %p1400_p0 }
  0x2a   : > { %1203 = vmatmul.mubr.msk.bf16.gmra.mrb[4].mxu0 %vm443_vm0, %v1670_v20  ;;  %1225 = vmatpush3.bf16.msra.mxu1 %v1359_v22 }
  0x2b   : > { %1206 = vmatprep.mubr.msk.bf16.mxu0 %vm443_vm0, %v1672_v21  ;;  %1226 = vmatprep.subr.bf16.mxu1 %v1360_v32 }
  0x2e   : > { %1227 = vmatpush3.bf16.msra.mxu1 %v1360_v32 }
  0x2f   : > { %1228 = vmatprep.subr.bf16.mxu1 %v1361_v33 }
  0x32   : > { %1207 = vmatmul.mubr.msk.bf16.gmra.mrb[8].mxu0 %vm443_vm0, %v1685_v27  ;;  %1229 = vmatpush3.bf16.msra.mxu1 %v1361_v33 }
  0x33   : > { %1210 = vmatprep.mubr.msk.bf16.mxu0 %vm443_vm0, %v1687_v28 }
  0x3a   : > { %1211 = vmatmul.mubr.msk.bf16.gmra.mrb[12].mxu0 %vm443_vm0, %v1695_v31 }
  0xf5   : > { %v1200_v35 = vpop.f32.mrb[0].mxu0 }
  0xf6   : > { %v511_v36 = vadd.f32 %v1200_v35, %v1123_v34  ;;  %v502_v37 = vpop.f32.mrb[1].mxu0 }
  0xf7   : > { %v503_v38 = vadd.f32 %v1123_v34, %v502_v37  ;;  %v1201_v39 = vpop.f32.mrb[2].mxu0 }
  0xf8   : > { %v514_v40 = vadd.f32 %v1201_v39, %v1123_v34  ;;  %v505_v41 = vpop.f32.mrb[3].mxu0  ;;  %v567_v43 = vmax.f32 %v511_v36, 0.0  ;;  %v1510_v36 = vmov 0.0  }
  0xf9   : > { %v506_v42 = vadd.f32 %v1123_v34, %v505_v41  ;;  %v565_v45 = vmax.f32 %v503_v38, 0.0  ;;  %1246 = vmatprep.subr.bf16.mxu0 %v1510_v36  ;;  %1266 = vmatprep.subr.bf16.mxu1 %v1510_v36  ;;  %393 = vst.msk [vmem:[#allocation3] sm:$0xf] %vm391_vm2, %v1510_v36 }
  0xfa   : > { %v568_v44 = vmax.f32 %v514_v40, 0.0  ;;  %1262 = vmatprep.mubr.msk.bf16.mxu0 %vm1511_vm1, %v1510_v36  ;;  %395 = vst.msk [vmem:[#allocation4] sm:$0xf] %vm394_vm5, %v1510_v36 }
  0xfb   : > { %v566_v46 = vmax.f32 %v506_v42, 0.0 }
  0xfc   : > { %v582_v47 = vpack.c.bf16 %v568_v44, %v567_v43 }
  0xfd   : > { %v1204_v48 = vpop.f32.mrb[4].mxu0  ;;  %v581_v49 = vpack.c.bf16 %v566_v46, %v565_v45 }
  0xfe   : > { %v527_v50 = vadd.f32 %v1204_v48, %v1123_v34  ;;  %v518_v51 = vpop.f32.mrb[5].mxu0 }
  0xff   : > { %v519_v52 = vadd.f32 %v1123_v34, %v518_v51  ;;  %1230 = vmatprep.mubr.bf16.mxu1 %v581_v49  ;;  %v1205_v53 = vpop.f32.mrb[6].mxu0 }
 0x100   : > { %v571_v54 = vmax.f32 %v527_v50, 0.0  ;;  %v530_v55 = vadd.f32 %v1205_v53, %v1123_v34  ;;  %1231 = vmatmul.mubr.bf16.vlgmr.msra.gmra.mrb[0].mxu1 %v582_v47  ;;  %v521_v56 = vpop.f32.mrb[7].mxu0 }
 0x101   : > { %v569_v57 = vmax.f32 %v519_v52, 0.0  ;;  %v522_v58 = vadd.f32 %v1123_v34, %v521_v56  ;;  %1267 = vmatpush3.bf16.msra.mxu1 %v1645_v8  ;;  %v1134_v8 = vld [vmem:[%s1865_s5] ss:$0 sm:$0xff] }
 0x102   : > { %v572_v59 = vmax.f32 %v530_v55, 0.0  ;;  %1268 = vmatprep.subr.bf16.mxu1 %v1510_v36 }
 0x103   : > { %v570_v60 = vmax.f32 %v522_v58, 0.0 }
 0x104   : > { %v584_v61 = vpack.c.bf16 %v572_v59, %v571_v54 }
 0x105   : > { %v583_v62 = vpack.c.bf16 %v570_v60, %v569_v57  ;;  %v1208_v63 = vpop.f32.mrb[8].mxu0  ;;  %1269 = vmatpush3.bf16.msra.mxu1 %v1650_v12 }
 0x106   : > { %v543_v0 = vadd.f32 %v1208_v63, %v1123_v34  ;;  %v534_v1 = vpop.f32.mrb[9].mxu0  ;;  %1270 = vmatprep.subr.bf16.mxu1 %v1510_v36 }
 0x107   : > { %1234 = vmatprep.mubr.bf16.mxu1 %v583_v62  ;;  %v535_v2 = vadd.f32 %v1123_v34, %v534_v1  ;;  %v1209_v3 = vpop.f32.mrb[10].mxu0 }
 0x108   : > { %1235 = vmatmul.mubr.bf16.gmra.mrb[4].mxu1 %v584_v61  ;;  %v575_v4 = vmax.f32 %v543_v0, 0.0  ;;  %v546_v5 = vadd.f32 %v1209_v3, %v1123_v34  ;;  %v537_v6 = vpop.f32.mrb[11].mxu0 }
 0x109   : > { %v573_v7 = vmax.f32 %v535_v2, 0.0  ;;  %v538_v9 = vadd.f32 %v1123_v34, %v537_v6  ;;  %1271 = vmatpush3.bf16.msra.mxu1 %v1652_v13 }
 0x10a   : > { %v576_v10 = vmax.f32 %v546_v5, 0.0  ;;  %1272 = vmatprep.subr.bf16.mxu1 %v1510_v36 }
 0x10b   : > { %v574_v11 = vmax.f32 %v538_v9, 0.0 }
 0x10c   : > { %v586_v14 = vpack.c.bf16 %v576_v10, %v575_v4 }
 0x10d   : > { %v585_v15 = vpack.c.bf16 %v574_v11, %v573_v7  ;;  %v1212_v16 = vpop.f32.mrb[12].mxu0  ;;  %1273 = vmatpush3.bf16.msra.mxu1 %v1670_v20 }
 0x10e   : > { %v559_v17 = vadd.f32 %v1212_v16, %v1123_v34  ;;  %v550_v18 = vpop.f32.mrb[13].mxu0  ;;  %1274 = vmatprep.subr.bf16.mxu1 %v1510_v36 }
 0x10f   : > { %1238 = vmatprep.mubr.bf16.mxu1 %v585_v15  ;;  %v551_v19 = vadd.f32 %v1123_v34, %v550_v18  ;;  %v1213_v22 = vpop.f32.mrb[14].mxu0 }
 0x110   : > { %1239 = vmatmul.mubr.bf16.gmra.mrb[8].mxu1 %v586_v14  ;;  %v579_v23 = vmax.f32 %v559_v17, 0.0  ;;  %v562_v24 = vadd.f32 %v1213_v22, %v1123_v34  ;;  %v553_v25 = vpop.f32.mrb[15].mxu0 }
 0x111   : > { %v577_v26 = vmax.f32 %v551_v19, 0.0  ;;  %v554_v29 = vadd.f32 %v1123_v34, %v553_v25  ;;  %1275 = vmatpush3.bf16.msra.mxu1 %v1672_v21 }
 0x112   : > { %v580_v30 = vmax.f32 %v562_v24, 0.0  ;;  %1276 = vmatprep.subr.bf16.mxu1 %v1510_v36 }
 0x113   : > { %v578_v32 = vmax.f32 %v554_v29, 0.0  ;;  %v1512_v29 = vmov -1e+30  }
 0x114   : > { %v588_v33 = vpack.c.bf16 %v580_v30, %v579_v23  ;;  %392 = vst.msk [vmem:[#allocation2] sm:$0xf] %vm391_vm2, %v1512_v29  ;;  %v824_v30 = vlaneseq }
 0x115   : > { %v587_v35 = vpack.c.bf16 %v578_v32, %v577_v26  ;;  %1277 = vmatpush3.bf16.msra.mxu1 %v1685_v27  ;;  %v781_v26 = vld [vmem:[%s1878_s1] sm:$0x3]  ;;  %s1404_s1 = scalar_lea.vmem %s1403_s0, 128 }
 0x116   : > { %1278 = vmatprep.subr.bf16.mxu1 %v1510_v36  ;;  %v825_v32 = vand.u32 127, %v824_v30  ;;  %p1406_p3 = scmp.lt.s32.totalorder %s1404_s1, %s1398_s23 }
 0x117   : > { %1242 = vmatprep.mubr.bf16.mxu1 %v587_v35 }
 0x118   : > { %1243 = vmatmul.mubr.bf16.gmra.mrb[12].mxu1 %v588_v33  ;;  %v826_v33 = vstv %s1143_s18  ;;  %p1407_p5 = por %p1406_p3, %p1405_p2 }
 0x119   : > { %1279 = vmatpush3.bf16.msra.mxu1 %v1687_v28  ;;  %1282 = vmatprep.mubr.msk.bf16.mxu1 %vm1511_vm1, %v1510_v36  ;;  %v827_v35 = vadd.s32 %v826_v33, %v825_v32 }
 0x11a   : > { %1280 = vmatprep.subr.bf16.mxu1 %v1510_v36  ;;  %p1408_p6 = pnand %p1407_p5, %p1401_p1 }
 0x11b   : > { %vm828_vm3 = vcmp.lt.s32.totalorder %v827_v35, 8 }
 0x11d   : > { %1281 = vmatpush3.bf16.msra.mxu1 %v1695_v31 }
 0x1d3   : > { %v1232_v12 = vpop.f32.mrb[0].mxu1 }
 0x1d4   : > { %v703_v13 = vadd.f32 %v1232_v12, %v1134_v8  ;;  %v694_v20 = vpop.f32.mrb[1].mxu1 }
 0x1d5   : > { %v695_v21 = vadd.f32 %v1134_v8, %v694_v20  ;;  %v1233_v27 = vpop.f32.mrb[2].mxu1 }
 0x1d6   : > { %1362 = vtanh.f32 %v703_v13  ;;  %v706_v28 = vadd.f32 %v1233_v27, %v1134_v8  ;;  %v697_v34 = vpop.f32.mrb[3].mxu1 }
 0x1d7   : > { %1364 = vtanh.f32 %v695_v21  ;;  %v698_v37 = vadd.f32 %v1134_v8, %v697_v34  ;;  %v831_v34 = vld [vmem:[#allocation2] sm:$0xf] }
 0x1d8   : > { %1366 = vtanh.f32 %v706_v28  ;;  %v1513_v28 = vmov 0  }
 0x1d9   : > { %1368 = vtanh.f32 %v698_v37  ;;  %1350 = vset.pattern.permute.xlu0 %v1513_v28  ;;  %1351 = vset.pattern.permute.xlu1 %v1513_v28 }
 0x1db   : > { %v1236_v31 = vpop.f32.mrb[4].mxu1 }
 0x1dc   : > { %v719_v38 = vadd.f32 %v1236_v31, %v1134_v8  ;;  %v710_v39 = vpop.f32.mrb[5].mxu1 }
 0x1dd   : > { %v711_v40 = vadd.f32 %v1134_v8, %v710_v39  ;;  %v1237_v41 = vpop.f32.mrb[6].mxu1 }
 0x1de   : > { %1370 = vtanh.f32 %v719_v38  ;;  %v722_v42 = vadd.f32 %v1237_v41, %v1134_v8  ;;  %v713_v43 = vpop.f32.mrb[7].mxu1 }
 0x1df   : > { %1372 = vtanh.f32 %v711_v40  ;;  %v714_v44 = vadd.f32 %v1134_v8, %v713_v43 }
 0x1e0   : > { %v1363_v45 = vpop.eup %1362  ;;  %1374 = vtanh.f32 %v722_v42 }
 0x1e1   : > { %v1365_v46 = vpop.eup %1364  ;;  %1376 = vtanh.f32 %v714_v44 }
 0x1e2   : > { %v1367_v47 = vpop.eup %1366 }
 0x1e3   : > { %v1369_v48 = vpop.eup %1368  ;;  %v1240_v49 = vpop.f32.mrb[8].mxu1  ;;  %v774_v50 = vpack.c.bf16 %v1367_v47, %v1363_v45 }
 0x1e4   : > { %v773_v51 = vpack.c.bf16 %v1369_v48, %v1365_v46  ;;  %v735_v52 = vadd.f32 %v1240_v49, %v1134_v8  ;;  %v726_v53 = vpop.f32.mrb[9].mxu1 }
 0x1e5   : > { %v727_v54 = vadd.f32 %v1134_v8, %v726_v53  ;;  %v1241_v55 = vpop.f32.mrb[10].mxu1 }
 0x1e6   : > { %1247 = vmatpush3.bf16.xpose.msra.mxu0 %v773_v51  ;;  %1378 = vtanh.f32 %v735_v52  ;;  %v738_v56 = vadd.f32 %v1241_v55, %v1134_v8  ;;  %v729_v57 = vpop.f32.mrb[11].mxu1 }
 0x1e7   : > { %1380 = vtanh.f32 %v727_v54  ;;  %1248 = vmatprep.subr.bf16.mxu0 %v1510_v36  ;;  %v730_v58 = vadd.f32 %v1134_v8, %v729_v57 }
 0x1e8   : > { %v1371_v59 = vpop.eup %1370  ;;  %1382 = vtanh.f32 %v738_v56 }
 0x1e9   : > { %v1373_v60 = vpop.eup %1372  ;;  %1384 = vtanh.f32 %v730_v58 }
 0x1ea   : > { %v1375_v61 = vpop.eup %1374 }
 0x1eb   : > { %v1377_v62 = vpop.eup %1376  ;;  %v1244_v63 = vpop.f32.mrb[12].mxu1  ;;  %v776_v0 = vpack.c.bf16 %v1375_v61, %v1371_v59 }
 0x1ec   : > { %v775_v1 = vpack.c.bf16 %v1377_v62, %v1373_v60  ;;  %v751_v2 = vadd.f32 %v1244_v63, %v1134_v8  ;;  %v742_v3 = vpop.f32.mrb[13].mxu1 }
 0x1ed   : > { %v743_v4 = vadd.f32 %v1134_v8, %v742_v3  ;;  %v1245_v5 = vpop.f32.mrb[14].mxu1 }
 0x1ee   : > { %1249 = vmatpush3.bf16.xpose.msra.mxu0 %v774_v50  ;;  %1386 = vtanh.f32 %v751_v2  ;;  %v754_v6 = vadd.f32 %v1245_v5, %v1134_v8  ;;  %v745_v7 = vpop.f32.mrb[15].mxu1 }
 0x1ef   : > { %1250 = vmatprep.subr.bf16.mxu0 %v1510_v36  ;;  %1388 = vtanh.f32 %v743_v4  ;;  %v746_v9 = vadd.f32 %v1134_v8, %v745_v7 }
 0x1f0   : > { %v1379_v10 = vpop.eup %1378  ;;  %1390 = vtanh.f32 %v754_v6 }
 0x1f1   : > { %v1381_v11 = vpop.eup %1380  ;;  %1392 = vtanh.f32 %v746_v9 }
 0x1f2   : > { %v1383_v14 = vpop.eup %1382 }
 0x1f3   : > { %v1385_v15 = vpop.eup %1384  ;;  %v778_v16 = vpack.c.bf16 %v1383_v14, %v1379_v10 }
 0x1f4   : > { %v777_v17 = vpack.c.bf16 %v1385_v15, %v1381_v11 }
 0x1f6   : > { %1251 = vmatpush3.bf16.xpose.msra.mxu0 %v775_v1 }
 0x1f7   : > { %1252 = vmatprep.subr.bf16.mxu0 %v1510_v36 }
 0x1f8   : > { %v1387_v18 = vpop.eup %1386 }
 0x1f9   : > { %v1389_v19 = vpop.eup %1388 }
 0x1fa   : > { %v1391_v22 = vpop.eup %1390 }
 0x1fb   : > { %v1393_v23 = vpop.eup %1392  ;;  %v780_v24 = vpack.c.bf16 %v1391_v22, %v1387_v18 }
 0x1fc   : > { %v779_v25 = vpack.c.bf16 %v1393_v23, %v1389_v19 }
 0x1fe   : > { %1253 = vmatpush3.bf16.xpose.msra.mxu0 %v776_v0 }
 0x1ff   : > { %1254 = vmatprep.subr.bf16.mxu0 %v1510_v36 }
 0x206   : > { %1255 = vmatpush3.bf16.xpose.msra.mxu0 %v777_v17 }
 0x207   : > { %1256 = vmatprep.subr.bf16.mxu0 %v1510_v36 }
 0x20e   : > { %1257 = vmatpush3.bf16.xpose.msra.mxu0 %v778_v16 }
 0x20f   : > { %1258 = vmatprep.subr.bf16.mxu0 %v1510_v36 }
 0x216   : > { %1259 = vmatpush3.bf16.xpose.msra.mxu0 %v779_v25 }
 0x217   : > { %1260 = vmatprep.subr.bf16.mxu0 %v1510_v36 }
 0x21e   : > { %1261 = vmatpush3.bf16.xpose.msra.mxu0 %v780_v24 }
 0x225   : > { %1263 = vmatmul.mubr.bf16.vlgmr.msra.gmra.mrb[16].mxu0 %v781_v26 }
 0x2f8   : > { %v816_v8 = vpop.f32.mrb[16].mxu0 }
 0x2f9   : > { %v829_v12 = vsel %vm828_vm3, %v816_v8, -1e+30  ;;  %v1264_v13 = vpop.f32.mrb[17].mxu0 }
 0x2fa   : > { %830 = vst [vmem:[%s1750_s26] sm:$0xf] %v829_v12  ;;  %v819_v20 = vpop.f32.mrb[18].mxu0  ;;  %v833_v21 = vsel %vm832_vm4, %v829_v12, -inf }
 0x2fb   : > { %834 = vmax.xlane.f32.xlu0 %v833_v21  ;;  %v1265_v27 = vpop.f32.mrb[19].mxu0 }
 0x388   : > { %v835_v37 = vpop.xlane.xlu0 %834 }
 0x389   : > { %v836_v31 = vmax.f32 %v831_v34, %v835_v37 }
 0x38b   : > { %v837_v38 = vsub.f32 %v831_v34, %v836_v31  ;;  %907 = vst.msk [vmem:[#allocation2] sm:$0xf] %vm391_vm2, %v836_v31  ;;  %842 = vperm.xlu0 %1350, %v836_v31  }
 0x38d   : > { %v838_v46 = vmul.f32 1.442695, %v837_v38 }
 0x392   : > { %v913_v39 = vld [vmem:[#allocation2] sm:$0xf] }
 0x393   : > { %914 = vst.msk [vmem:[%s381_s29] sm:$0xf] %vm391_vm2, %v913_v39  ;;  %s918_s29 = scalar_lea.sflag [#allocation6], %s1745_s20 }
 0x40a   : > { %v843_v40 = vpop.permute.xlu0 %842 }
 0x40b   : > { %v845_v41 = vsub.f32 %v829_v12, %v843_v40 }
 0x40d   : > { %v846_v42 = vmul.f32 1.442695, %v845_v41 }
 0x40f   : > { %1394 = vpow2.f32 %v846_v42 }
 0x410   : > { %1396 = vpow2.f32 %v838_v46 }
 0x419   : > { %v1395_v43 = vpop.eup %1394 }
 0x41a   : > { %v850_v44 = vsel %vm832_vm4, %v1395_v43, 0.0  ;;  %v863_v45 = vpack.c.bf16 %v1395_v43, %v1395_v43  ;;  %v1397_v47 = vpop.eup %1396 }
 0x41b   : > { %851 = vadd.xlane.f32.xlu1 %v850_v44 }
 0x41c   : > { %1283 = vmatmul.mubr.bf16.vlgmr.msra.gmra.mrb[16].mxu1 %v863_v45 }
 0x42c   : > { %859 = vperm.xlu1 %1351, %v1397_v47  }
 0x42d   : > { %1411 = shalt.err (!%p1408_p6)
}
 0x42e   : > { %s1412_s26 = scalar_lea.hbm %s1775_s28, 64  ;;  %s1416_s25 = scalar_lea.hbm %s1866_s6, 128 }
 0x42f   : > { %p1413_p7 = scmp.ne.s32.totalorder %s1775_s28, %s1412_s26  ;;  %p1417_p11 = scmp.lt.u32.totalorder %s1775_s28, %s1866_s6 }
 0x430   : > { %p1418_p12 = scmp.lt.u32.totalorder %s1416_s25, %s1412_s26  ;;  %p1420_p0 = scmp.lt.u32.totalorder %s1412_s26, %s1775_s28 }
 0x431   : > { %p1414_p9 = pnand %p1413_p7, %p1606_p4 }
 0x432   : > { %p1419_p13 = por %p1418_p12, %p1417_p11 }
 0x433   : > { %p1415_p10 = pneg %p1414_p9 }
 0x434   : > { %p1421_p1 = por %p1420_p0, %p1419_p13 }
 0x436   : > { %p1422_p2 = pnand %p1421_p1, %p1415_p10 }
 0x438   : > { %1425 = shalt.err (!%p1422_p2)
}
 0x439   : > { %1286 = dma.vmem_to_hbm [thread:$0]  (%p1606_p4), %s946_s24, 64, %s1775_s28, %s918_s29   ;;  %v848_v36 = vld [vmem:[#allocation3] sm:$0xf]  ;;  %v856_v52 = vld [vmem:[#allocation4] sm:$0xf] }
 0x43a   : > { %v849_v48 = vmul.f32 %v1397_v47, %v848_v36  ;;  %s1879_s1 = sshll.u32 %s1756_s27, 2  ;;  %s1880_s27 = sshll.u32 %s1745_s20, 2 }
 0x43b   : > { %s385_s26 = scalar_lea.vmem %s1869_s9, %s1879_s1  ;;  %s356_s28 = scalar_lea.vmem [#allocation7], %s1880_s27 }
 0x43c   : > { %s958_s24 = sshll.u32 %s356_s28, 4  ;;  %s1881_s29 = sshll.u32 %s1500_s12, 6  ;;  %s1813_s24 = int_to_ptr.vmem [resolvable:$true] %s958_s24 }
 0x43d   : > { %s1811_s25 = scalar_lea.hbm %s1867_s7, %s1881_s29  ;;  %s923_s0 = scalar_lea.sflag [#allocation8], %s1745_s20 }
 0x43e   : > { %s1426_s1 = scalar_lea.vmem %s1813_s24, 64  ;;  %s1515_s12 = smov [#allocation7]  }
 0x43f   : > { %p1427_p3 = scmp.ne.s32.totalorder %s1813_s24, %s1426_s1  ;;  %s1430_s23 = sshll.u32 %s1515_s12, 4  ;;  %s1431_s23 = int_to_ptr.vmem [resolvable:$false] %s1430_s23 }
 0x440   : > { %s1432_s15 = scalar_lea.vmem %s1431_s23, 128  ;;  %p1433_p7 = scmp.lt.s32.totalorder %s1813_s24, %s1431_s23 }
 0x441   : > { %p1428_p5 = pnand %p1427_p3, %p1606_p4  ;;  %p1434_p9 = scmp.lt.s32.totalorder %s1432_s15, %s1426_s1 }
 0x443   : > { %p1429_p6 = pneg %p1428_p5  ;;  %p1435_p10 = por %p1434_p9, %p1433_p7 }
 0x445   : > { %p1436_p11 = pnand %p1435_p10, %p1429_p6 }
 0x4a8   : > { %v852_v49 = vpop.xlane.xlu1 %851 }
 0x4a9   : > { %v853_v50 = vadd.f32 %v852_v49, %v849_v48 }
 0x4ab   : > { %855 = vst.msk [vmem:[#allocation3] sm:$0xf] %vm391_vm2, %v853_v50 }
 0x4ac   : > { %v860_v53 = vpop.permute.xlu1 %859 }
 0x4ad   : > { %v862_v54 = vmul.f32 %v860_v53, %v856_v52 }
 0x4b2   : > { %v915_v51 = vld [vmem:[#allocation3] sm:$0xf] }
 0x4b3   : > { %916 = vst.msk [vmem:[%s385_s26] sm:$0xf] %vm391_vm2, %v915_v51 }
 0x4ef   : > { %v898_v55 = vpop.f32.mrb[16].mxu1 }
 0x4f0   : > { %v904_v56 = vadd.f32 %v898_v55, %v862_v54  ;;  %v1284_v57 = vpop.f32.mrb[17].mxu1 }
 0x4f1   : > { %v901_v58 = vpop.f32.mrb[18].mxu1 }
 0x4f2   : > { %906 = vst.msk [vmem:[#allocation4] sm:$0xf] %vm394_vm5, %v904_v56  ;;  %v1285_v59 = vpop.f32.mrb[19].mxu1 }
 0x4f9   : > { %v911_v60 = vld [vmem:[#allocation4] sm:$0xf] }
 0x4fa   : > { %912 = vst.msk [vmem:[%s356_s28] sm:$0xf] %vm394_vm5, %v911_v60 }
 0x4fb   : > { %1439 = shalt.err (!%p1436_p11)
}
 0x4fc   : > { %s1440_s20 = scalar_lea.hbm %s1811_s25, 64  ;;  %s1444_s28 = scalar_lea.hbm %s1867_s7, 128 }
 0x4fd   : > { %p1441_p12 = scmp.ne.s32.totalorder %s1811_s25, %s1440_s20  ;;  %p1445_p1 = scmp.lt.u32.totalorder %s1811_s25, %s1867_s7 }
 0x4fe   : > { %p1446_p2 = scmp.lt.u32.totalorder %s1444_s28, %s1440_s20  ;;  %p1448_p5 = scmp.lt.u32.totalorder %s1440_s20, %s1811_s25 }
 0x4ff   : > { %p1442_p13 = pnand %p1441_p12, %p1606_p4 }
 0x500   : > { %p1447_p3 = por %p1446_p2, %p1445_p1 }
 0x501   : > { %p1443_p0 = pneg %p1442_p13 }
 0x502   : > { %p1449_p6 = por %p1448_p5, %p1447_p3 }
 0x504   : > { %p1450_p7 = pnand %p1449_p6, %p1443_p0 }
 0x506   : > { %1453 = shalt.err (!%p1450_p7)
}
 0x507   : > { %1287 = dma.vmem_to_hbm [thread:$0]  (%p1606_p4), %s1813_s24, 64, %s1811_s25, %s923_s0  }
 0x508 PF: > { %p1297_p9 = scmp.ge.s32.totalorder %s1508_s14, 2  ;;  %s976_s18 = sand.u32 1, %s1488_s30  }
 0x509   : > { %s977_s1 = scalar_lea.sflag [#allocation6], %s976_s18 }
 0x50a   : > { %p1291_p10 = pnand %p1297_p9, %p1613_p8 }
 0x50c   : > { %1479 = dma.done.wait (!%p1291_p10), %s977_s1, 64  }
 0x50d   : > { %1481 = vsyncadd (!%p1291_p10), %s977_s1, 4294967232  ;;  %s986_s12 = scalar_lea.sflag [#allocation8], %s976_s18 }
 0x50e   : > { %1483 = dma.done.wait (!%p1291_p10), %s986_s12, 64  }
 0x50f   : > { %1485 = vsyncadd (!%p1291_p10), %s986_s12, 4294967232  ;;  %s26_s14 = sadd.s32 1, %s1508_s14   ;;  %s1882_s30 = smov %s1492_s10 }
 0x510   : > { %p23_p11 = scmp.ge.s32.totalorder %s26_s14, 4   ;;  %s1883_s10 = smov %s1496_s11 }
 0x511   : > { %s1884_s11 = smov %s1619_s22  ;;  %s1885_s12 = smov %s1504_s13 }
 0x512   : > { %s1886_s13 = smov %s1888_s17  ;;  %25 = sbr.rel (!%p23_p11) target bundleno = 9 (0x9), region = 128 }
 0x519   :  { %1005 = vsyncpa [#allocation6], 1 }
 0x51a   :  { %1007 = vsyncpa [#allocation6 + $0x1], 1 }
 0x51b   :  { %1008 = vsyncpa [#allocation8], 1 }
 0x51c   :  { %1010 = vsyncpa [#allocation8 + $0x1], 1 }

</bundles_post_ra>
